<compile_context>
chip_gen: v7x
topology: tpu7x:2x2x1
jax: 0.10.0
libtpu: 0.0.40
codegen_flags: <defaults>
</compile_context>

<pallas_src>
import jax
import jax.numpy as jnp
from jax.experimental import pallas as pl
from jax.experimental.pallas import tpu as pltpu


# ----------------------------------------------------------------------------
# Fused kernel: x -> [Linear -> (BN train stats) -> ReLU] * num_layers -> out
# ----------------------------------------------------------------------------
def make_fused_mlp_kernel(num_layers, apply_bn, eps=1e-5):
    def kernel(*refs):
        x_ref = refs[0]
        o_ref = refs[-1]
        a = x_ref[...].astype(jnp.float32)                      # (B, K0)
        for l in range(num_layers):
            w_ref, b_ref, g_ref, be_ref = refs[1 + 4 * l: 1 + 4 * (l + 1)]
            # bf16 x bf16 MXU matmul, f32 accumulation.
            h = jnp.dot(a.astype(jnp.bfloat16), w_ref[...],
                        preferred_element_type=jnp.float32) + b_ref[...]
            if apply_bn:
                # BatchNorm1d (training): biased batch stats over axis 0,
                # folded into a single scale/shift FMA.
                mean = jnp.mean(h, axis=0, keepdims=True)        # (1, N)
                var = jnp.mean((h - mean) * (h - mean), axis=0, keepdims=True)
                scale = g_ref[...] * jax.lax.rsqrt(var + eps)
                shift = be_ref[...] - mean * scale
                h = h * scale + shift
            a = jnp.maximum(h, 0.0)
        o_ref[...] = a.astype(o_ref.dtype)
    return kernel


def weight_masked_mlp_forward(x, params, stage):
    """x: (B, C, H, W) NCHW.  Returns (B, output_dim) f32."""
    B = x.shape[0]
    a = x.reshape(B, -1).astype(jnp.float32)   # == torch x.view(B, -1)
    apply_bn = (stage == "train")
    num_layers = len(params)
    out_dim = params[-1]["w_t"].shape[1]
    pad = (-out_dim) % 128                     # lane-dense final output slab

    flat_inputs = [a]
    in_specs = [pl.BlockSpec(a.shape, lambda: (0, 0))]
    for l, p in enumerate(params):
        w, b, g, be = p["w_t"], p["b"], p["gamma"], p["beta"]
        if l == num_layers - 1 and pad:
            # Padded zero columns stay exactly 0 through BN+ReLU (var=0 ->
            # scale finite, shift=0), sliced off after the kernel.
            w = jnp.pad(w, ((0, 0), (0, pad)))
            b = jnp.pad(b, (0, pad))
            g = jnp.pad(g, (0, pad), constant_values=1.0)
            be = jnp.pad(be, (0, pad))
        n = w.shape[1]
        flat_inputs += [w, b.reshape(1, n), g.reshape(1, n), be.reshape(1, n)]
        in_specs += [
            pl.BlockSpec(w.shape, lambda: (0, 0)),
            pl.BlockSpec((1, n), lambda: (0, 0)),
            pl.BlockSpec((1, n), lambda: (0, 0)),
            pl.BlockSpec((1, n), lambda: (0, 0)),
        ]

    n_out = out_dim + pad
    # Scoped-VMEM limit computed from actual footprint (<< 48 MiB, safe on v7x).
    vmem_need = sum(int(t.size) * t.dtype.itemsize for t in flat_inputs)
    vmem_need += B * n_out * 4
    vmem_limit = int(min(4 * vmem_need + (1 << 20), 48 << 20))

    out = pl.pallas_call(
        make_fused_mlp_kernel(num_layers, apply_bn),
        out_shape=jax.ShapeDtypeStruct((B, n_out), jnp.float32),
        in_specs=in_specs,
        out_specs=pl.BlockSpec((B, n_out), lambda: (0, 0)),
        compiler_params=pltpu.CompilerParams(vmem_limit_bytes=vmem_limit),
    )(*flat_inputs)
    return out[:, :out_dim]


# ----------------------------------------------------------------------------
# Parameter construction (mimics nn.Linear default init; weights in bf16)
# ----------------------------------------------------------------------------
def init_params(key, input_dim, hidden_dims, output_dim):
    dims = [input_dim] + list(hidden_dims) + [output_dim]
    params = []
    for l in range(len(dims) - 1):
        fan_in, fan_out = dims[l], dims[l + 1]
        key, kw, kb = jax.random.split(key, 3)
        bound = 1.0 / (fan_in ** 0.5)
        # Stored transposed (in_features, out_features), bf16 for the MXU.
        w_t = jax.random.uniform(kw, (fan_in, fan_out), jnp.float32,
                                 -bound, bound).astype(jnp.bfloat16)
        b = jax.random.uniform(kb, (fan_out,), jnp.float32, -bound, bound)
        gamma = jnp.ones((fan_out,), jnp.float32)    # BatchNorm1d weight
        beta = jnp.zeros((fan_out,), jnp.float32)    # BatchNorm1d bias
        # NOTE: the HAT weight mask `wm` (zeros) never affects the reference
        # forward output and is intentionally not materialized.
        params.append(dict(w_t=w_t, b=b, gamma=gamma, beta=beta))
    return params


# Pure-JAX reference with identical numerics (bf16 matmul operands, f32 acc).
def reference_forward(x, params, stage, eps=1e-5):
    B = x.shape[0]
    a = x.reshape(B, -1).astype(jnp.float32)
    for p in params:
        h = jnp.dot(a.astype(jnp.bfloat16), p["w_t"],
                    preferred_element_type=jnp.float32) + p["b"]
        if stage == "train":
            mean = h.mean(axis=0, keepdims=True)
            var = ((h - mean) ** 2).mean(axis=0, keepdims=True)
            scale = p["gamma"] * jax.lax.rsqrt(var + eps)
            shift = p["beta"] - mean * scale
            h = h * scale + shift
        a = jnp.maximum(h, 0.0)
    return a


if __name__ == "__main__":
    # Small shapes consistent with the module: input_dim = C*H*W = 1024.
    B, C, H, W = 8, 4, 16, 16
    hidden_dims = [256, 256]
    output_dim = 64

    key = jax.random.PRNGKey(0)
    kx, kp = jax.random.split(key)
    x = jax.random.normal(kx, (B, C, H, W), jnp.float32)
    params = init_params(kp, C * H * W, hidden_dims, output_dim)

    for stage in ("train", "test"):
        out = weight_masked_mlp_forward(x, params, stage)
        out = jax.block_until_ready(out)
        ref = reference_forward(x, params, stage)
        assert out.shape == (B, output_dim)
        err = float(jnp.max(jnp.abs(out - ref)))
        assert jnp.allclose(out, ref, atol=1e-3, rtol=1e-3), (
            f"mismatch for stage={stage}: max abs err {err}")

    print("KERNEL_OK")
</pallas_src>

<mosaic_0001>
module attributes {stable_mosaic.version = 11 : i64} {
  func.func @kernel(%arg0: memref<8x1024xf32, #tpu.memory_space<vmem>>, %arg1: memref<1024x256xbf16, #tpu.memory_space<vmem>>, %arg2: memref<1x256xf32, #tpu.memory_space<vmem>>, %arg3: memref<1x256xf32, #tpu.memory_space<vmem>>, %arg4: memref<1x256xf32, #tpu.memory_space<vmem>>, %arg5: memref<256x256xbf16, #tpu.memory_space<vmem>>, %arg6: memref<1x256xf32, #tpu.memory_space<vmem>>, %arg7: memref<1x256xf32, #tpu.memory_space<vmem>>, %arg8: memref<1x256xf32, #tpu.memory_space<vmem>>, %arg9: memref<256x128xbf16, #tpu.memory_space<vmem>>, %arg10: memref<1x128xf32, #tpu.memory_space<vmem>>, %arg11: memref<1x128xf32, #tpu.memory_space<vmem>>, %arg12: memref<1x128xf32, #tpu.memory_space<vmem>>, %arg13: memref<8x128xf32, #tpu.memory_space<vmem>>) attributes {dimension_semantics = [], scalar_prefetch = 0 : i64, scratch_operands = 0 : i64, tpu.core_type = #tpu.core_type<tc>} {
    %c0 = arith.constant 0 : index
    %c0_0 = arith.constant 0 : index
    %0 = vector.load %arg0[%c0, %c0_0] : memref<8x1024xf32, #tpu.memory_space<vmem>>, vector<8x1024xf32>
    %1 = arith.truncf %0 : vector<8x1024xf32> to vector<8x1024xbf16>
    %c0_1 = arith.constant 0 : index
    %c0_2 = arith.constant 0 : index
    %2 = vector.load %arg1[%c0_1, %c0_2] : memref<1024x256xbf16, #tpu.memory_space<vmem>>, vector<1024x256xbf16>
    %cst = arith.constant dense<0.000000e+00> : vector<8x256xf32>
    %3 = tpu.matmul %1, %2, %cst {dimension_numbers = #tpu.dot_dimension_numbers<[1], [0], [0], [1], [0, 0, 1, 1], [], []>} : vector<8x1024xbf16>, vector<1024x256xbf16>, vector<8x256xf32> -> vector<8x256xf32>
    %c0_3 = arith.constant 0 : index
    %c0_4 = arith.constant 0 : index
    %4 = vector.load %arg2[%c0_3, %c0_4] : memref<1x256xf32, #tpu.memory_space<vmem>>, vector<1x256xf32>
    %5 = vector.broadcast %4 : vector<1x256xf32> to vector<8x256xf32>
    %6 = arith.addf %3, %5 : vector<8x256xf32>
    %cst_5 = arith.constant dense<0.000000e+00> : vector<256xf32>
    %7 = vector.multi_reduction <add>, %6, %cst_5 [0] : vector<8x256xf32> to vector<256xf32>
    %8 = vector.shape_cast %7 : vector<256xf32> to vector<1x256xf32>
    %cst_6 = arith.constant 8.000000e+00 : f32
    %9 = vector.broadcast %cst_6 : f32 to vector<1x256xf32>
    %10 = arith.divf %8, %9 : vector<1x256xf32>
    %11 = vector.broadcast %10 : vector<1x256xf32> to vector<8x256xf32>
    %12 = arith.subf %6, %11 : vector<8x256xf32>
    %13 = vector.broadcast %10 : vector<1x256xf32> to vector<8x256xf32>
    %14 = arith.subf %6, %13 : vector<8x256xf32>
    %15 = arith.mulf %12, %14 : vector<8x256xf32>
    %cst_7 = arith.constant dense<0.000000e+00> : vector<256xf32>
    %16 = vector.multi_reduction <add>, %15, %cst_7 [0] : vector<8x256xf32> to vector<256xf32>
    %17 = vector.shape_cast %16 : vector<256xf32> to vector<1x256xf32>
    %cst_8 = arith.constant 8.000000e+00 : f32
    %18 = vector.broadcast %cst_8 : f32 to vector<1x256xf32>
    %19 = arith.divf %17, %18 : vector<1x256xf32>
    %c0_9 = arith.constant 0 : index
    %c0_10 = arith.constant 0 : index
    %20 = vector.load %arg3[%c0_9, %c0_10] : memref<1x256xf32, #tpu.memory_space<vmem>>, vector<1x256xf32>
    %cst_11 = arith.constant 9.99999974E-6 : f32
    %21 = vector.broadcast %cst_11 : f32 to vector<1x256xf32>
    %22 = arith.addf %19, %21 : vector<1x256xf32>
    %23 = math.rsqrt %22 : vector<1x256xf32>
    %24 = arith.mulf %20, %23 : vector<1x256xf32>
    %c0_12 = arith.constant 0 : index
    %c0_13 = arith.constant 0 : index
    %25 = vector.load %arg4[%c0_12, %c0_13] : memref<1x256xf32, #tpu.memory_space<vmem>>, vector<1x256xf32>
    %26 = arith.mulf %10, %24 : vector<1x256xf32>
    %27 = arith.subf %25, %26 : vector<1x256xf32>
    %28 = vector.broadcast %24 : vector<1x256xf32> to vector<8x256xf32>
    %29 = arith.mulf %6, %28 : vector<8x256xf32>
    %30 = vector.broadcast %27 : vector<1x256xf32> to vector<8x256xf32>
    %31 = arith.addf %29, %30 : vector<8x256xf32>
    %cst_14 = arith.constant 0.000000e+00 : f32
    %32 = vector.broadcast %cst_14 : f32 to vector<8x256xf32>
    %33 = arith.maximumf %31, %32 : vector<8x256xf32>
    %34 = arith.truncf %33 : vector<8x256xf32> to vector<8x256xbf16>
    %c0_15 = arith.constant 0 : index
    %c0_16 = arith.constant 0 : index
    %35 = vector.load %arg5[%c0_15, %c0_16] : memref<256x256xbf16, #tpu.memory_space<vmem>>, vector<256x256xbf16>
    %cst_17 = arith.constant dense<0.000000e+00> : vector<8x256xf32>
    %36 = tpu.matmul %34, %35, %cst_17 {dimension_numbers = #tpu.dot_dimension_numbers<[1], [0], [0], [1], [0, 0, 1, 1], [], []>} : vector<8x256xbf16>, vector<256x256xbf16>, vector<8x256xf32> -> vector<8x256xf32>
    %c0_18 = arith.constant 0 : index
    %c0_19 = arith.constant 0 : index
    %37 = vector.load %arg6[%c0_18, %c0_19] : memref<1x256xf32, #tpu.memory_space<vmem>>, vector<1x256xf32>
    %38 = vector.broadcast %37 : vector<1x256xf32> to vector<8x256xf32>
    %39 = arith.addf %36, %38 : vector<8x256xf32>
    %cst_20 = arith.constant dense<0.000000e+00> : vector<256xf32>
    %40 = vector.multi_reduction <add>, %39, %cst_20 [0] : vector<8x256xf32> to vector<256xf32>
    %41 = vector.shape_cast %40 : vector<256xf32> to vector<1x256xf32>
    %cst_21 = arith.constant 8.000000e+00 : f32
    %42 = vector.broadcast %cst_21 : f32 to vector<1x256xf32>
    %43 = arith.divf %41, %42 : vector<1x256xf32>
    %44 = vector.broadcast %43 : vector<1x256xf32> to vector<8x256xf32>
    %45 = arith.subf %39, %44 : vector<8x256xf32>
    %46 = vector.broadcast %43 : vector<1x256xf32> to vector<8x256xf32>
    %47 = arith.subf %39, %46 : vector<8x256xf32>
    %48 = arith.mulf %45, %47 : vector<8x256xf32>
    %cst_22 = arith.constant dense<0.000000e+00> : vector<256xf32>
    %49 = vector.multi_reduction <add>, %48, %cst_22 [0] : vector<8x256xf32> to vector<256xf32>
    %50 = vector.shape_cast %49 : vector<256xf32> to vector<1x256xf32>
    %cst_23 = arith.constant 8.000000e+00 : f32
    %51 = vector.broadcast %cst_23 : f32 to vector<1x256xf32>
    %52 = arith.divf %50, %51 : vector<1x256xf32>
    %c0_24 = arith.constant 0 : index
    %c0_25 = arith.constant 0 : index
    %53 = vector.load %arg7[%c0_24, %c0_25] : memref<1x256xf32, #tpu.memory_space<vmem>>, vector<1x256xf32>
    %cst_26 = arith.constant 9.99999974E-6 : f32
    %54 = vector.broadcast %cst_26 : f32 to vector<1x256xf32>
    %55 = arith.addf %52, %54 : vector<1x256xf32>
    %56 = math.rsqrt %55 : vector<1x256xf32>
    %57 = arith.mulf %53, %56 : vector<1x256xf32>
    %c0_27 = arith.constant 0 : index
    %c0_28 = arith.constant 0 : index
    %58 = vector.load %arg8[%c0_27, %c0_28] : memref<1x256xf32, #tpu.memory_space<vmem>>, vector<1x256xf32>
    %59 = arith.mulf %43, %57 : vector<1x256xf32>
    %60 = arith.subf %58, %59 : vector<1x256xf32>
    %61 = vector.broadcast %57 : vector<1x256xf32> to vector<8x256xf32>
    %62 = arith.mulf %39, %61 : vector<8x256xf32>
    %63 = vector.broadcast %60 : vector<1x256xf32> to vector<8x256xf32>
    %64 = arith.addf %62, %63 : vector<8x256xf32>
    %cst_29 = arith.constant 0.000000e+00 : f32
    %65 = vector.broadcast %cst_29 : f32 to vector<8x256xf32>
    %66 = arith.maximumf %64, %65 : vector<8x256xf32>
    %67 = arith.truncf %66 : vector<8x256xf32> to vector<8x256xbf16>
    %c0_30 = arith.constant 0 : index
    %c0_31 = arith.constant 0 : index
    %68 = vector.load %arg9[%c0_30, %c0_31] : memref<256x128xbf16, #tpu.memory_space<vmem>>, vector<256x128xbf16>
    %cst_32 = arith.constant dense<0.000000e+00> : vector<8x128xf32>
    %69 = tpu.matmul %67, %68, %cst_32 {dimension_numbers = #tpu.dot_dimension_numbers<[1], [0], [0], [1], [0, 0, 1, 1], [], []>} : vector<8x256xbf16>, vector<256x128xbf16>, vector<8x128xf32> -> vector<8x128xf32>
    %c0_33 = arith.constant 0 : index
    %c0_34 = arith.constant 0 : index
    %70 = vector.load %arg10[%c0_33, %c0_34] : memref<1x128xf32, #tpu.memory_space<vmem>>, vector<1x128xf32>
    %71 = vector.broadcast %70 : vector<1x128xf32> to vector<8x128xf32>
    %72 = arith.addf %69, %71 : vector<8x128xf32>
    %cst_35 = arith.constant dense<0.000000e+00> : vector<128xf32>
    %73 = vector.multi_reduction <add>, %72, %cst_35 [0] : vector<8x128xf32> to vector<128xf32>
    %74 = vector.shape_cast %73 : vector<128xf32> to vector<1x128xf32>
    %cst_36 = arith.constant 8.000000e+00 : f32
    %75 = vector.broadcast %cst_36 : f32 to vector<1x128xf32>
    %76 = arith.divf %74, %75 : vector<1x128xf32>
    %77 = vector.broadcast %76 : vector<1x128xf32> to vector<8x128xf32>
    %78 = arith.subf %72, %77 : vector<8x128xf32>
    %79 = vector.broadcast %76 : vector<1x128xf32> to vector<8x128xf32>
    %80 = arith.subf %72, %79 : vector<8x128xf32>
    %81 = arith.mulf %78, %80 : vector<8x128xf32>
    %cst_37 = arith.constant dense<0.000000e+00> : vector<128xf32>
    %82 = vector.multi_reduction <add>, %81, %cst_37 [0] : vector<8x128xf32> to vector<128xf32>
    %83 = vector.shape_cast %82 : vector<128xf32> to vector<1x128xf32>
    %cst_38 = arith.constant 8.000000e+00 : f32
    %84 = vector.broadcast %cst_38 : f32 to vector<1x128xf32>
    %85 = arith.divf %83, %84 : vector<1x128xf32>
    %c0_39 = arith.constant 0 : index
    %c0_40 = arith.constant 0 : index
    %86 = vector.load %arg11[%c0_39, %c0_40] : memref<1x128xf32, #tpu.memory_space<vmem>>, vector<1x128xf32>
    %cst_41 = arith.constant 9.99999974E-6 : f32
    %87 = vector.broadcast %cst_41 : f32 to vector<1x128xf32>
    %88 = arith.addf %85, %87 : vector<1x128xf32>
    %89 = math.rsqrt %88 : vector<1x128xf32>
    %90 = arith.mulf %86, %89 : vector<1x128xf32>
    %c0_42 = arith.constant 0 : index
    %c0_43 = arith.constant 0 : index
    %91 = vector.load %arg12[%c0_42, %c0_43] : memref<1x128xf32, #tpu.memory_space<vmem>>, vector<1x128xf32>
    %92 = arith.mulf %76, %90 : vector<1x128xf32>
    %93 = arith.subf %91, %92 : vector<1x128xf32>
    %94 = vector.broadcast %90 : vector<1x128xf32> to vector<8x128xf32>
    %95 = arith.mulf %72, %94 : vector<8x128xf32>
    %96 = vector.broadcast %93 : vector<1x128xf32> to vector<8x128xf32>
    %97 = arith.addf %95, %96 : vector<8x128xf32>
    %cst_44 = arith.constant 0.000000e+00 : f32
    %98 = vector.broadcast %cst_44 : f32 to vector<8x128xf32>
    %99 = arith.maximumf %97, %98 : vector<8x128xf32>
    %c0_45 = arith.constant 0 : index
    %c0_46 = arith.constant 0 : index
    %100 = vector.load %arg13[%c0_45, %c0_46] : memref<8x128xf32, #tpu.memory_space<vmem>>, vector<8x128xf32>
    tpu.vector_store %arg13[%c0_45, %c0_46], %99 {strides = array<i32>} : memref<8x128xf32, #tpu.memory_space<vmem>>, vector<8x128xf32>,
    return
  }
}

</mosaic_0001>

<bundles_post_ra>
// kernel: tpu_custom_call.1
= control target key start
LH: loop header
LB: loop body
LE: loop exit
PB: predicated region body
PF: predicated region fallthrough
CT: control target
= control target key end

     0   :  { %18 = vsyncpa [#allocation3], 0  ;;  %s2558_s0 = inlined_call_operand.hbm [shape: f32[8,1024], index: 0, kind: input, shape index: {}]   ;;  %s2559_s1 = inlined_call_operand.hbm [shape: bf16[1024,256], index: 1, kind: input, shape index: {}]   ;;  %s2560_s2 = inlined_call_operand.vmem [shape: f32[1,256], index: 2, kind: input, shape index: {}]   ;;  %s2561_s3 = inlined_call_operand.vmem [shape: f32[1,256], index: 3, kind: input, shape index: {}]   ;;  %s2562_s4 = inlined_call_operand.vmem [shape: f32[1,256], index: 4, kind: input, shape index: {}]   ;;  %s2563_s5 = inlined_call_operand.hbm [shape: bf16[256,256], index: 5, kind: input, shape index: {}]   ;;  %s2564_s6 = inlined_call_operand.vmem [shape: f32[1,256], index: 6, kind: input, shape index: {}]   ;;  %s2565_s7 = inlined_call_operand.vmem [shape: f32[1,256], index: 7, kind: input, shape index: {}]   ;;  %s2566_s8 = inlined_call_operand.vmem [shape: f32[1,256], index: 8, kind: input, shape index: {}]   ;;  %s2567_s9 = inlined_call_operand.hbm [shape: bf16[256,128], index: 9, kind: input, shape index: {}]   ;;  %s2568_s10 = inlined_call_operand.vmem [shape: f32[1,128], index: 10, kind: input, shape index: {}]   ;;  %s2569_s11 = inlined_call_operand.vmem [shape: f32[1,128], index: 11, kind: input, shape index: {}]   ;;  %s2570_s12 = inlined_call_operand.vmem [shape: f32[1,128], index: 12, kind: input, shape index: {}]   ;;  %s2571_s13 = inlined_call_operand.hbm [shape: f32[8,128], index: 13, kind: output, shape index: {}]  }
   0x1   :  { %19 = vsyncpa [#allocation6], 0 }
   0x2   :  { %20 = vsyncpa [#allocation9], 0 }
   0x3   :  { %21 = vsyncpa [#allocation4], 0  ;;  %s2357_s25 = smov [#allocation5]   ;;  %s2239_s29 = scalar_lea.hbm %s2559_s1, 16384 }
   0x4   :  { %s37_s26 = sshll.u32 %s2357_s25, 4  ;;  %p2240_p0 = scmp.ne.s32.totalorder %s2559_s1, %s2239_s29  ;;  %s38_s26 = int_to_ptr.vmem [resolvable:$true] %s37_s26 }
   0x5   :  { %p2243_p1 = scmp.lt.u32.totalorder %s2239_s29, %s2559_s1 }
   0x7   :  { %p2245_p2 = pnand %p2243_p1, %p2240_p0 }
   0x9   :  { %2248 = shalt.err (!%p2245_p2)
}
   0xa   :  { %s2249_s17 = scalar_lea.vmem %s38_s26, 16384  ;;  %p2254_p4 = scmp.lt.s32.totalorder %s38_s26, %s38_s26 }
   0xb   :  { %p2250_p3 = scmp.ne.s32.totalorder %s38_s26, %s2249_s17  ;;  %p2255_p5 = scmp.lt.s32.totalorder %s2249_s17, %s2249_s17 }
   0xd   :  { %p2256_p6 = por %p2255_p5, %p2254_p4 }
   0xf   :  { %p2257_p7 = pnand %p2256_p6, %p2250_p3 }
  0x11   :  { %2260 = shalt.err (!%p2257_p7)
}
  0x12   :  { %s2358_s18 = smov 128   ;;  %s2359_s19 = smov 8  }
  0x13   :  { %43 = dma.hbm_to_vmem [thread:$0]  %s2559_s1, 16384, %s38_s26, [#allocation6], %s2358_s18, %s2358_s18, %s2359_s19  }
  0x14   :  { %s2360_s22 = smov [#allocation2]   ;;  %s2361_s24 = smov [#allocation7]  }
  0x15   :  { %s28_s23 = sshll.u32 %s2360_s22, 4  ;;  %s55_s25 = sshll.u32 %s2361_s24, 4  ;;  %s29_s23 = int_to_ptr.vmem [resolvable:$true] %s28_s23  ;;  %s56_s25 = int_to_ptr.vmem [resolvable:$true] %s55_s25 }
  0x16   :  { %s2261_s29 = scalar_lea.hbm %s2558_s0, 1024 }
  0x17   :  { %p2262_p8 = scmp.ne.s32.totalorder %s2558_s0, %s2261_s29  ;;  %p2265_p9 = scmp.lt.u32.totalorder %s2261_s29, %s2558_s0 }
  0x19   :  { %p2267_p10 = pnand %p2265_p9, %p2262_p8 }
  0x1b   :  { %2270 = shalt.err (!%p2267_p10)
}
  0x1c   :  { %s2271_s1 = scalar_lea.vmem %s29_s23, 1024  ;;  %p2276_p12 = scmp.lt.s32.totalorder %s29_s23, %s29_s23 }
  0x1d   :  { %p2272_p11 = scmp.ne.s32.totalorder %s29_s23, %s2271_s1  ;;  %p2277_p13 = scmp.lt.s32.totalorder %s2271_s1, %s2271_s1 }
  0x1f   :  { %p2278_p0 = por %p2277_p13, %p2276_p12 }
  0x21   :  { %p2279_p1 = pnand %p2278_p0, %p2272_p11 }
  0x23   :  { %2282 = shalt.err (!%p2279_p1)
}
  0x24   :  { %31 = dma.hbm_to_vmem [thread:$0]  %s2558_s0, 1024, %s29_s23, [#allocation3]  }
  0x25   :  { %s2283_s22 = scalar_lea.hbm %s2563_s5, 4096 }
  0x26   :  { %p2284_p2 = scmp.ne.s32.totalorder %s2563_s5, %s2283_s22  ;;  %p2287_p3 = scmp.lt.u32.totalorder %s2283_s22, %s2563_s5 }
  0x28   :  { %p2289_p4 = pnand %p2287_p3, %p2284_p2 }
  0x2a   :  { %2292 = shalt.err (!%p2289_p4)
}
  0x2b   :  { %s2293_s30 = scalar_lea.vmem %s56_s25, 4096  ;;  %p2298_p6 = scmp.lt.s32.totalorder %s56_s25, %s56_s25 }
  0x2c   :  { %p2294_p5 = scmp.ne.s32.totalorder %s56_s25, %s2293_s30  ;;  %p2299_p7 = scmp.lt.s32.totalorder %s2293_s30, %s2293_s30 }
  0x2e   :  { %p2300_p8 = por %p2299_p7, %p2298_p6 }
  0x30   :  { %p2301_p9 = pnand %p2300_p8, %p2294_p5 }
  0x32   :  { %2304 = shalt.err (!%p2301_p9)
}
  0x33   :  { %61 = dma.hbm_to_vmem [thread:$0]  %s2563_s5, 4096, %s56_s25, [#allocation6], %s2358_s18, %s2358_s18, %s2359_s19  }
  0x34   :  { %s2362_s14 = smov [#allocation8]   ;;  %s2305_s26 = scalar_lea.hbm %s2567_s9, 2048 }
  0x35   :  { %s73_s15 = sshll.u32 %s2362_s14, 4  ;;  %p2306_p10 = scmp.ne.s32.totalorder %s2567_s9, %s2305_s26  ;;  %s74_s15 = int_to_ptr.vmem [resolvable:$true] %s73_s15 }
  0x36   :  { %p2309_p11 = scmp.lt.u32.totalorder %s2305_s26, %s2567_s9 }
  0x38   :  { %p2311_p12 = pnand %p2309_p11, %p2306_p10 }
  0x3a   :  { %2314 = shalt.err (!%p2311_p12)
}
  0x3b   :  { %s2315_s24 = scalar_lea.vmem %s74_s15, 2048  ;;  %p2320_p0 = scmp.lt.s32.totalorder %s74_s15, %s74_s15 }
  0x3c   :  { %p2316_p13 = scmp.ne.s32.totalorder %s74_s15, %s2315_s24  ;;  %p2321_p1 = scmp.lt.s32.totalorder %s2315_s24, %s2315_s24 }
  0x3e   :  { %p2322_p2 = por %p2321_p1, %p2320_p0 }
  0x40   :  { %p2323_p3 = pnand %p2322_p2, %p2316_p13 }
  0x42   :  { %2326 = shalt.err (!%p2323_p3)
}
  0x43   :  { %s2363_s5 = smov 64   ;;  %s2364_s18 = smov 4  }
  0x44   :  { %79 = dma.hbm_to_vmem [thread:$0]  %s2567_s9, 2048, %s74_s15, [#allocation9], %s2363_s5, %s2363_s5, %s2364_s18  }
  0x45   :  { %2349 = dma.done.wait [#allocation3], 1024  }
  0x46   :  { %2350 = vsyncadd [#allocation3], 4294966272 }
  0x47   :  { %2351 = dma.done.wait [#allocation6], 20480  }
  0x48   :  { %2352 = vsyncadd [#allocation6], 4294946816 }
  0x49   :  { %2353 = dma.done.wait [#allocation9], 2048  }
  0x4a   :  { %2354 = vsyncadd [#allocation9], 4294965248  ;;  %v1973_v0 = vld [vmem:[#allocation5 + $0x104] ss:$8 sps:$4 sm:$0xff]   ;;  %v1975_v1 = vld [vmem:[#allocation5 + $0x100] ss:$8 sps:$4 sm:$0xff]  }
  0x4b   :  { %936 = vmatprep.subr.bf16.mxu0 %v1973_v0  ;;  %v1976_v2 = vld [vmem:[#allocation5 + $0x114] ss:$8 sps:$4 sm:$0xff]   ;;  %v1978_v3 = vld [vmem:[#allocation5 + $0x110] ss:$8 sps:$4 sm:$0xff]   ;;  %v1979_v4 = vld [vmem:[#allocation5 + $0x124] ss:$8 sps:$4 sm:$0xff]  }
  0x4c   :  { %937 = vmatpush1.bf16.msra.mxu0 %v1975_v1  ;;  %v1981_v5 = vld [vmem:[#allocation5 + $0x120] ss:$8 sps:$4 sm:$0xff]   ;;  %v1982_v6 = vld [vmem:[#allocation5 + $0x134] ss:$8 sps:$4 sm:$0xff]   ;;  %v1984_v7 = vld [vmem:[#allocation5 + $0x130] ss:$8 sps:$4 sm:$0xff]  }
  0x4d   :  { %938 = vmatprep.subr.bf16.mxu0 %v1976_v2  ;;  %v1985_v8 = vld [vmem:[#allocation5 + $0x144] ss:$8 sps:$4 sm:$0xff]   ;;  %v1987_v9 = vld [vmem:[#allocation5 + $0x140] ss:$8 sps:$4 sm:$0xff]   ;;  %v1988_v10 = vld [vmem:[#allocation5 + $0x154] ss:$8 sps:$4 sm:$0xff]  }
  0x4e   :  { %v1990_v11 = vld [vmem:[#allocation5 + $0x150] ss:$8 sps:$4 sm:$0xff]   ;;  %v1991_v12 = vld [vmem:[#allocation5 + $0x164] ss:$8 sps:$4 sm:$0xff]   ;;  %v1993_v15 = vld [vmem:[#allocation5 + $0x160] ss:$8 sps:$4 sm:$0xff]  }
  0x4f   :  { %v102_v13 = vld [vmem:[#allocation2 + $0x18] sm:$0xff]  ;;  %v1997_v18 = vld [vmem:[#allocation5 + $0x184] ss:$8 sps:$4 sm:$0xff]   ;;  %v1999_v19 = vld [vmem:[#allocation5 + $0x180] ss:$8 sps:$4 sm:$0xff]   ;;  %s2366_s26 = smov [#allocation10]  }
  0x50   :  { %939 = vmatpush1.bf16.msra.mxu0 %v1978_v3  ;;  %v110_v14 = vpack.c.bf16 %v102_v13, %v102_v13  ;;  %v1994_v16 = vld [vmem:[#allocation5 + $0x174] ss:$8 sps:$4 sm:$0xff]   ;;  %v1996_v17 = vld [vmem:[#allocation5 + $0x170] ss:$8 sps:$4 sm:$0xff]   ;;  %v2003_v22 = vld [vmem:[#allocation5 + $0x1a4] ss:$8 sps:$4 sm:$0xff]  }
  0x51   :  { %940 = vmatprep.subr.bf16.mxu0 %v1979_v4  ;;  %v2000_v20 = vld [vmem:[#allocation5 + $0x194] ss:$8 sps:$4 sm:$0xff]   ;;  %v2002_v21 = vld [vmem:[#allocation5 + $0x190] ss:$8 sps:$4 sm:$0xff]   ;;  %v2005_v23 = vld [vmem:[#allocation5 + $0x1a0] ss:$8 sps:$4 sm:$0xff]  }
  0x52   :  { %968 = vmatprep.mubr.bf16.mxu0 %v110_v14  ;;  %v2006_v24 = vld [vmem:[#allocation5 + $0x1b4] ss:$8 sps:$4 sm:$0xff]   ;;  %v2008_v25 = vld [vmem:[#allocation5 + $0x1b0] ss:$8 sps:$4 sm:$0xff]   ;;  %v2066_v26 = vld [vmem:[#allocation5 + $0x4] ss:$8 sps:$4 sm:$0xff]  }
  0x53   :  { %v2068_v27 = vld [vmem:[#allocation5] ss:$8 sps:$4 sm:$0xff]   ;;  %v2009_v28 = vld [vmem:[#allocation5 + $0x1c4] ss:$8 sps:$4 sm:$0xff]   ;;  %895 = vmatprep.subr.bf16.mxu1 %v2066_v26  ;;  %v2072_v29 = vld [vmem:[#allocation5 + $0x14] ss:$8 sps:$4 sm:$0xff]  }
  0x54   :  { %941 = vmatpush1.bf16.msra.mxu0 %v1981_v5  ;;  %896 = vmatpush1.bf16.msra.mxu1 %v2068_v27  ;;  %v2074_v30 = vld [vmem:[#allocation5 + $0x10] ss:$8 sps:$4 sm:$0xff]   ;;  %v2011_v31 = vld [vmem:[#allocation5 + $0x1c0] ss:$8 sps:$4 sm:$0xff]   ;;  %v2012_v32 = vld [vmem:[#allocation5 + $0x1d4] ss:$8 sps:$4 sm:$0xff]  }
  0x55   :  { %942 = vmatprep.subr.bf16.mxu0 %v1982_v6  ;;  %897 = vmatprep.subr.bf16.mxu1 %v2072_v29  ;;  %v2078_v33 = vld [vmem:[#allocation5 + $0x24] ss:$8 sps:$4 sm:$0xff]   ;;  %v2080_v34 = vld [vmem:[#allocation5 + $0x20] ss:$8 sps:$4 sm:$0xff]   ;;  %v2014_v35 = vld [vmem:[#allocation5 + $0x1d0] ss:$8 sps:$4 sm:$0xff]  }
  0x56   :  { %v2084_v36 = vld [vmem:[#allocation5 + $0x34] ss:$8 sps:$4 sm:$0xff]   ;;  %v2015_v37 = vld [vmem:[#allocation5 + $0x1e4] ss:$8 sps:$4 sm:$0xff]   ;;  %v2086_v38 = vld [vmem:[#allocation5 + $0x30] ss:$8 sps:$4 sm:$0xff]  }
  0x57   :  { %v2090_v39 = vld [vmem:[#allocation5 + $0x44] ss:$8 sps:$4 sm:$0xff]   ;;  %v2017_v40 = vld [vmem:[#allocation5 + $0x1e0] ss:$8 sps:$4 sm:$0xff]   ;;  %v2018_v41 = vld [vmem:[#allocation5 + $0x1f4] ss:$8 sps:$4 sm:$0xff]  }
  0x58   :  { %943 = vmatpush1.bf16.msra.mxu0 %v1984_v7  ;;  %898 = vmatpush1.bf16.msra.mxu1 %v2074_v30  ;;  %v2092_v42 = vld [vmem:[#allocation5 + $0x40] ss:$8 sps:$4 sm:$0xff]   ;;  %v2020_v43 = vld [vmem:[#allocation5 + $0x1f0] ss:$8 sps:$4 sm:$0xff]   ;;  %v2096_v44 = vld [vmem:[#allocation5 + $0x54] ss:$8 sps:$4 sm:$0xff]  }
  0x59   :  { %944 = vmatprep.subr.bf16.mxu0 %v1985_v8  ;;  %899 = vmatprep.subr.bf16.mxu1 %v2078_v33  ;;  %v2023_v45 = vld [vmem:[#allocation5 + $0x204] ss:$8 sps:$4 sm:$0xff]   ;;  %v101_v46 = vld [vmem:[#allocation2 + $0x10] sm:$0xff]  ;;  %v2021_v51 = vld [vmem:[#allocation5 + $0x200] ss:$8 sps:$4 sm:$0xff]   ;;  %s1741_s17 = sshll.u32 %s2366_s26, 4  ;;  %s1742_s17 = int_to_ptr.vmem [resolvable:$true] %s1741_s17 }
  0x5a   :  { %v104_v47 = vld [vmem:[#allocation2 + $0x28] sm:$0xff]  ;;  %v2098_v48 = vld [vmem:[#allocation5 + $0x50] ss:$8 sps:$4 sm:$0xff]   ;;  %v109_v49 = vpack.c.bf16 %v101_v46, %v101_v46  ;;  %v2026_v53 = vld [vmem:[#allocation5 + $0x214] ss:$8 sps:$4 sm:$0xff]   ;;  %p2332_p5 = scmp.lt.s32.totalorder %s1742_s17, %s1742_s17 }
  0x5b   :  { %v2102_v50 = vld [vmem:[#allocation5 + $0x64] ss:$8 sps:$4 sm:$0xff]   ;;  %v112_v52 = vpack.c.bf16 %v104_v47, %v104_v47  ;;  %v2104_v54 = vld [vmem:[#allocation5 + $0x60] ss:$8 sps:$4 sm:$0xff]   ;;  %v2108_v55 = vld [vmem:[#allocation5 + $0x74] ss:$8 sps:$4 sm:$0xff]  }
  0x5c   :  { %945 = vmatpush1.bf16.msra.mxu0 %v1987_v9  ;;  %900 = vmatpush1.bf16.msra.mxu1 %v2080_v34  ;;  %v2024_v56 = vld [vmem:[#allocation5 + $0x210] ss:$8 sps:$4 sm:$0xff]   ;;  %v2029_v57 = vld [vmem:[#allocation5 + $0x224] ss:$8 sps:$4 sm:$0xff]   ;;  %v2027_v60 = vld [vmem:[#allocation5 + $0x220] ss:$8 sps:$4 sm:$0xff]  }
  0x5d   :  { %946 = vmatprep.subr.bf16.mxu0 %v1988_v10  ;;  %901 = vmatprep.subr.bf16.mxu1 %v2084_v36  ;;  %v2110_v58 = vld [vmem:[#allocation5 + $0x70] ss:$8 sps:$4 sm:$0xff]   ;;  %v2114_v59 = vld [vmem:[#allocation5 + $0x84] ss:$8 sps:$4 sm:$0xff]   ;;  %v2032_v61 = vld [vmem:[#allocation5 + $0x234] ss:$8 sps:$4 sm:$0xff]  }
  0x5e   :  { %v2116_v62 = vld [vmem:[#allocation5 + $0x80] ss:$8 sps:$4 sm:$0xff]   ;;  %v2120_v63 = vld [vmem:[#allocation5 + $0x94] ss:$8 sps:$4 sm:$0xff]   ;;  %v2030_v0 = vld [vmem:[#allocation5 + $0x230] ss:$8 sps:$4 sm:$0xff]  }
  0x5f   :  { %v2035_v1 = vld [vmem:[#allocation5 + $0x244] ss:$8 sps:$4 sm:$0xff]   ;;  %v2122_v2 = vld [vmem:[#allocation5 + $0x90] ss:$8 sps:$4 sm:$0xff]   ;;  %v2033_v4 = vld [vmem:[#allocation5 + $0x240] ss:$8 sps:$4 sm:$0xff]  }
  0x60   :  { %947 = vmatpush1.bf16.msra.mxu0 %v1990_v11  ;;  %902 = vmatpush1.bf16.msra.mxu1 %v2086_v38  ;;  %v2126_v3 = vld [vmem:[#allocation5 + $0xa4] ss:$8 sps:$4 sm:$0xff]   ;;  %v2038_v5 = vld [vmem:[#allocation5 + $0x254] ss:$8 sps:$4 sm:$0xff]   ;;  %v2128_v6 = vld [vmem:[#allocation5 + $0xa0] ss:$8 sps:$4 sm:$0xff]  }
  0x61   :  { %948 = vmatprep.subr.bf16.mxu0 %v1991_v12  ;;  %903 = vmatprep.subr.bf16.mxu1 %v2090_v39  ;;  %v2132_v7 = vld [vmem:[#allocation5 + $0xb4] ss:$8 sps:$4 sm:$0xff]   ;;  %v2036_v8 = vld [vmem:[#allocation5 + $0x250] ss:$8 sps:$4 sm:$0xff]   ;;  %v2041_v9 = vld [vmem:[#allocation5 + $0x264] ss:$8 sps:$4 sm:$0xff]  }
  0x62   :  { %v2134_v10 = vld [vmem:[#allocation5 + $0xb0] ss:$8 sps:$4 sm:$0xff]   ;;  %v100_v11 = vld [vmem:[#allocation2 + $0x8] sm:$0xff]  ;;  %v99_v29 = vld [vmem:[#allocation2] sm:$0xff] }
  0x63   :  { %v2138_v12 = vld [vmem:[#allocation5 + $0xc4] ss:$8 sps:$4 sm:$0xff]   ;;  %v108_v13 = vpack.c.bf16 %v100_v11, %v100_v11  ;;  %v2039_v14 = vld [vmem:[#allocation5 + $0x260] ss:$8 sps:$4 sm:$0xff]   ;;  %v2048_v26 = vld [vmem:[#allocation5 + $0x290] ss:$8 sps:$4 sm:$0xff]  }
  0x64   :  { %949 = vmatpush1.bf16.msra.mxu0 %v1993_v15  ;;  %904 = vmatpush1.bf16.msra.mxu1 %v2092_v42  ;;  %v2044_v15 = vld [vmem:[#allocation5 + $0x274] ss:$8 sps:$4 sm:$0xff]   ;;  %v2053_v27 = vld [vmem:[#allocation5 + $0x2a4] ss:$8 sps:$4 sm:$0xff]   ;;  %v2051_v30 = vld [vmem:[#allocation5 + $0x2a0] ss:$8 sps:$4 sm:$0xff]  }
  0x65   :  { %950 = vmatprep.subr.bf16.mxu0 %v1994_v16  ;;  %905 = vmatprep.subr.bf16.mxu1 %v2096_v44  ;;  %v2140_v16 = vld [vmem:[#allocation5 + $0xc0] ss:$8 sps:$4 sm:$0xff]   ;;  %v2054_v33 = vld [vmem:[#allocation5 + $0x2b0] ss:$8 sps:$4 sm:$0xff]   ;;  %v2059_v34 = vld [vmem:[#allocation5 + $0x2c4] ss:$8 sps:$4 sm:$0xff]  }
  0x66   :  { %927 = vmatprep.mubr.bf16.mxu1 %v108_v13  ;;  %v2062_v36 = vld [vmem:[#allocation5 + $0x2d4] ss:$8 sps:$4 sm:$0xff]   ;;  %v2065_v38 = vld [vmem:[#allocation5 + $0x2e4] ss:$8 sps:$4 sm:$0xff]   ;;  %v2063_v39 = vld [vmem:[#allocation5 + $0x2e0] ss:$8 sps:$4 sm:$0xff]  }
  0x67   :  { %v103_v42 = vld [vmem:[#allocation2 + $0x20] sm:$0xff]  ;;  %v106_v44 = vld [vmem:[#allocation2 + $0x38] sm:$0xff] }
  0x68   :  { %951 = vmatpush1.bf16.msra.mxu0 %v1996_v17  ;;  %906 = vmatpush1.bf16.msra.mxu1 %v2098_v48  ;;  %v2144_v17 = vld [vmem:[#allocation5 + $0xd4] ss:$8 sps:$4 sm:$0xff]   ;;  %v2075_v46 = vld [vmem:[#allocation5 + $0x300] ss:$8 sps:$4 sm:$0xff]   ;;  %v114_v47 = vpack.c.bf16 %v106_v44, %v106_v44  ;;  %v2162_v13 = vld [vmem:[#allocation5 + $0x3f0] ss:$8 sps:$4 sm:$0xff]  }
  0x69   :  { %952 = vmatprep.subr.bf16.mxu0 %v1997_v18  ;;  %907 = vmatprep.subr.bf16.mxu1 %v2102_v50  ;;  %v2042_v18 = vld [vmem:[#allocation5 + $0x270] ss:$8 sps:$4 sm:$0xff]   ;;  %v2083_v48 = vld [vmem:[#allocation5 + $0x314] ss:$8 sps:$4 sm:$0xff]   ;;  %v2089_v50 = vld [vmem:[#allocation5 + $0x324] ss:$8 sps:$4 sm:$0xff]  }
  0x6a   :  { %v2159_v11 = vld [vmem:[#allocation5 + $0x3e0] ss:$8 sps:$4 sm:$0xff]   ;;  %v2203_v44 = vld [vmem:[#allocation7 + $0xc4] ss:$8 sps:$4 sm:$0xff]  }
  0x6c   :  { %953 = vmatpush1.bf16.msra.mxu0 %v1999_v19  ;;  %908 = vmatpush1.bf16.msra.mxu1 %v2104_v54  ;;  %v2047_v19 = vld [vmem:[#allocation5 + $0x284] ss:$8 sps:$4 sm:$0xff]  }
  0x6d   :  { %954 = vmatprep.subr.bf16.mxu0 %v2000_v20  ;;  %909 = vmatprep.subr.bf16.mxu1 %v2108_v55  ;;  %v2146_v20 = vld [vmem:[#allocation5 + $0xd0] ss:$8 sps:$4 sm:$0xff]   ;;  %v2101_v54 = vld [vmem:[#allocation5 + $0x344] ss:$8 sps:$4 sm:$0xff]   ;;  %v2099_v55 = vld [vmem:[#allocation5 + $0x340] ss:$8 sps:$4 sm:$0xff]  }
  0x70   :  { %955 = vmatpush1.bf16.msra.mxu0 %v2002_v21  ;;  %910 = vmatpush1.bf16.msra.mxu1 %v2110_v58  ;;  %v2150_v21 = vld [vmem:[#allocation5 + $0xe4] ss:$8 sps:$4 sm:$0xff]  }
  0x71   :  { %956 = vmatprep.subr.bf16.mxu0 %v2003_v22  ;;  %911 = vmatprep.subr.bf16.mxu1 %v2114_v59  ;;  %v2045_v22 = vld [vmem:[#allocation5 + $0x280] ss:$8 sps:$4 sm:$0xff]   ;;  %v2113_v58 = vld [vmem:[#allocation5 + $0x364] ss:$8 sps:$4 sm:$0xff]  }
  0x72   :  { %v2111_v59 = vld [vmem:[#allocation5 + $0x360] ss:$8 sps:$4 sm:$0xff]  }
  0x74   :  { %957 = vmatpush1.bf16.msra.mxu0 %v2005_v23  ;;  %912 = vmatpush1.bf16.msra.mxu1 %v2116_v62  ;;  %v2050_v23 = vld [vmem:[#allocation5 + $0x294] ss:$8 sps:$4 sm:$0xff]   ;;  %v2125_v62 = vld [vmem:[#allocation5 + $0x384] ss:$8 sps:$4 sm:$0xff]  }
  0x75   :  { %958 = vmatprep.subr.bf16.mxu0 %v2006_v24  ;;  %913 = vmatprep.subr.bf16.mxu1 %v2120_v63  ;;  %v2152_v24 = vld [vmem:[#allocation5 + $0xe0] ss:$8 sps:$4 sm:$0xff]  }
  0x76   :  { %v2123_v63 = vld [vmem:[#allocation5 + $0x380] ss:$8 sps:$4 sm:$0xff]  }
  0x78   :  { %959 = vmatpush1.bf16.msra.mxu0 %v2008_v25  ;;  %914 = vmatpush1.bf16.msra.mxu1 %v2122_v2  ;;  %v2156_v25 = vld [vmem:[#allocation5 + $0xf4] ss:$8 sps:$4 sm:$0xff]   ;;  %v2137_v2 = vld [vmem:[#allocation5 + $0x3a4] ss:$8 sps:$4 sm:$0xff]  }
  0x79   :  { %960 = vmatprep.subr.bf16.mxu0 %v2009_v28  ;;  %915 = vmatprep.subr.bf16.mxu1 %v2126_v3  ;;  %v2158_v28 = vld [vmem:[#allocation5 + $0xf0] ss:$8 sps:$4 sm:$0xff]   ;;  %v2135_v3 = vld [vmem:[#allocation5 + $0x3a0] ss:$8 sps:$4 sm:$0xff]  }
  0x7c   :  { %961 = vmatpush1.bf16.msra.mxu0 %v2011_v31  ;;  %916 = vmatpush1.bf16.msra.mxu1 %v2128_v6  ;;  %v2056_v31 = vld [vmem:[#allocation5 + $0x2b4] ss:$8 sps:$4 sm:$0xff]   ;;  %v2149_v6 = vld [vmem:[#allocation5 + $0x3c4] ss:$8 sps:$4 sm:$0xff]  }
  0x7d   :  { %962 = vmatprep.subr.bf16.mxu0 %v2012_v32  ;;  %917 = vmatprep.subr.bf16.mxu1 %v2132_v7  ;;  %v107_v32 = vpack.c.bf16 %v99_v29, %v99_v29  ;;  %v2147_v7 = vld [vmem:[#allocation5 + $0x3c0] ss:$8 sps:$4 sm:$0xff]  }
  0x7e   :  { %v2183_v29 = vld [vmem:[#allocation7 + $0x60] ss:$8 sps:$4 sm:$0xff]  }
  0x80   :  { %963 = vmatpush1.bf16.msra.mxu0 %v2014_v35  ;;  %918 = vmatpush1.bf16.msra.mxu1 %v2134_v10  ;;  %v2057_v35 = vld [vmem:[#allocation5 + $0x2c0] ss:$8 sps:$4 sm:$0xff]   ;;  %v2161_v10 = vld [vmem:[#allocation5 + $0x3e4] ss:$8 sps:$4 sm:$0xff]  }
  0x81   :  { %964 = vmatprep.subr.bf16.mxu0 %v2015_v37  ;;  %919 = vmatprep.subr.bf16.mxu1 %v2138_v12  ;;  %v2060_v37 = vld [vmem:[#allocation5 + $0x2d0] ss:$8 sps:$4 sm:$0xff]   ;;  %v2164_v12 = vld [vmem:[#allocation5 + $0x3f4] ss:$8 sps:$4 sm:$0xff]  }
  0x84   :  { %965 = vmatpush1.bf16.msra.mxu0 %v2017_v40  ;;  %920 = vmatpush1.bf16.msra.mxu1 %v2140_v16  ;;  %v2071_v40 = vld [vmem:[#allocation5 + $0x2f4] ss:$8 sps:$4 sm:$0xff]   ;;  %v2167_v16 = vld [vmem:[#allocation7 + $0x4] ss:$8 sps:$4 sm:$0xff]  }
  0x85   :  { %966 = vmatprep.subr.bf16.mxu0 %v2018_v41  ;;  %921 = vmatprep.subr.bf16.mxu1 %v2144_v17  ;;  %v2069_v41 = vld [vmem:[#allocation5 + $0x2f0] ss:$8 sps:$4 sm:$0xff]   ;;  %v2165_v17 = vld [vmem:[#allocation7] ss:$8 sps:$4 sm:$0xff]  }
  0x88   :  { %967 = vmatpush1.bf16.msra.mxu0 %v2020_v43  ;;  %922 = vmatpush1.bf16.msra.mxu1 %v2146_v20  ;;  %v2077_v43 = vld [vmem:[#allocation5 + $0x304] ss:$8 sps:$4 sm:$0xff]  }
  0x89   :  { %977 = vmatprep.subr.bf16.mxu0 %v2023_v45  ;;  %923 = vmatprep.subr.bf16.mxu1 %v2150_v21  ;;  %v111_v45 = vpack.c.bf16 %v103_v42, %v103_v42  ;;  %v2173_v20 = vld [vmem:[#allocation7 + $0x24] ss:$8 sps:$4 sm:$0xff]   ;;  %v2171_v21 = vld [vmem:[#allocation7 + $0x20] ss:$8 sps:$4 sm:$0xff]   ;;  %v2200_v42 = vld [vmem:[#allocation7 + $0xb4] ss:$8 sps:$4 sm:$0xff]  }
  0x8b   :  { %969 = vmatmul.mubr.bf16.vlgmr.msra.gmra.mrb[0].mxu0 %v109_v49  ;;  %v2081_v49 = vld [vmem:[#allocation5 + $0x310] ss:$8 sps:$4 sm:$0xff]  }
  0x8c   :  { %978 = vmatpush1.bf16.msra.mxu0 %v2021_v51  ;;  %1009 = vmatprep.mubr.bf16.mxu0 %v112_v52  ;;  %v2087_v51 = vld [vmem:[#allocation5 + $0x320] ss:$8 sps:$4 sm:$0xff]   ;;  %v2095_v52 = vld [vmem:[#allocation5 + $0x334] ss:$8 sps:$4 sm:$0xff]  }
  0x8d   :  { %979 = vmatprep.subr.bf16.mxu0 %v2026_v53  ;;  %924 = vmatpush1.bf16.msra.mxu1 %v2152_v24  ;;  %v2093_v53 = vld [vmem:[#allocation5 + $0x330] ss:$8 sps:$4 sm:$0xff]   ;;  %v2179_v24 = vld [vmem:[#allocation7 + $0x44] ss:$8 sps:$4 sm:$0xff]  }
  0x8e   :  { %925 = vmatprep.subr.bf16.mxu1 %v2156_v25  ;;  %v2177_v25 = vld [vmem:[#allocation7 + $0x40] ss:$8 sps:$4 sm:$0xff]  }
  0x90   :  { %980 = vmatpush1.bf16.msra.mxu0 %v2024_v56  ;;  %v2107_v56 = vld [vmem:[#allocation5 + $0x354] ss:$8 sps:$4 sm:$0xff]  }
  0x91   :  { %981 = vmatprep.subr.bf16.mxu0 %v2029_v57  ;;  %926 = vmatpush1.bf16.msra.mxu1 %v2158_v28  ;;  %v2105_v57 = vld [vmem:[#allocation5 + $0x350] ss:$8 sps:$4 sm:$0xff]   ;;  %v2185_v28 = vld [vmem:[#allocation7 + $0x64] ss:$8 sps:$4 sm:$0xff]  }
  0x92   :  { %1372 = vmatprep.subr.bf16.mxu1 %v2167_v16 }
  0x94   :  { %982 = vmatpush1.bf16.msra.mxu0 %v2027_v60  ;;  %928 = vmatmul.mubr.bf16.vlgmr.msra.gmra.mrb[0].mxu1 %v107_v32  ;;  %v2119_v60 = vld [vmem:[#allocation5 + $0x374] ss:$8 sps:$4 sm:$0xff]   ;;  %v2191_v32 = vld [vmem:[#allocation7 + $0x84] ss:$8 sps:$4 sm:$0xff]  }
  0x95   :  { %983 = vmatprep.subr.bf16.mxu0 %v2032_v61  ;;  %v2117_v61 = vld [vmem:[#allocation5 + $0x370] ss:$8 sps:$4 sm:$0xff]   ;;  %1373 = vmatpush1.bf16.msra.mxu1 %v2165_v17 }
  0x98   :  { %984 = vmatpush1.bf16.msra.mxu0 %v2030_v0  ;;  %v2131_v0 = vld [vmem:[#allocation5 + $0x394] ss:$8 sps:$4 sm:$0xff]  }
  0x99   :  { %985 = vmatprep.subr.bf16.mxu0 %v2035_v1  ;;  %v2129_v1 = vld [vmem:[#allocation5 + $0x390] ss:$8 sps:$4 sm:$0xff]  }
  0x9c   :  { %986 = vmatpush1.bf16.msra.mxu0 %v2033_v4  ;;  %v2143_v4 = vld [vmem:[#allocation5 + $0x3b4] ss:$8 sps:$4 sm:$0xff]  }
  0x9d   :  { %987 = vmatprep.subr.bf16.mxu0 %v2038_v5  ;;  %v2141_v5 = vld [vmem:[#allocation5 + $0x3b0] ss:$8 sps:$4 sm:$0xff]  }
  0xa0   :  { %988 = vmatpush1.bf16.msra.mxu0 %v2036_v8  ;;  %v2155_v8 = vld [vmem:[#allocation5 + $0x3d4] ss:$8 sps:$4 sm:$0xff]  }
  0xa1   :  { %989 = vmatprep.subr.bf16.mxu0 %v2041_v9  ;;  %v2153_v9 = vld [vmem:[#allocation5 + $0x3d0] ss:$8 sps:$4 sm:$0xff]  }
  0xa4   :  { %990 = vmatpush1.bf16.msra.mxu0 %v2039_v14  ;;  %v105_v14 = vld [vmem:[#allocation2 + $0x30] sm:$0xff] }
  0xa5   :  { %991 = vmatprep.subr.bf16.mxu0 %v2044_v15  ;;  %v113_v15 = vpack.c.bf16 %v105_v14, %v105_v14 }
  0xa8   :  { %992 = vmatpush1.bf16.msra.mxu0 %v2042_v18  ;;  %v2170_v18 = vld [vmem:[#allocation7 + $0x14] ss:$8 sps:$4 sm:$0xff]  }
  0xa9   :  { %993 = vmatprep.subr.bf16.mxu0 %v2047_v19  ;;  %v2168_v19 = vld [vmem:[#allocation7 + $0x10] ss:$8 sps:$4 sm:$0xff]   ;;  %1374 = vmatprep.subr.bf16.mxu1 %v2170_v18 }
  0xaa   :  { %1375 = vmatpush1.bf16.msra.mxu1 %v2168_v19 }
  0xab   :  { %1376 = vmatprep.subr.bf16.mxu1 %v2173_v20 }
  0xac   :  { %994 = vmatpush1.bf16.msra.mxu0 %v2045_v22  ;;  %v2176_v22 = vld [vmem:[#allocation7 + $0x34] ss:$8 sps:$4 sm:$0xff]  }
  0xad   :  { %995 = vmatprep.subr.bf16.mxu0 %v2050_v23  ;;  %v2174_v23 = vld [vmem:[#allocation7 + $0x30] ss:$8 sps:$4 sm:$0xff]  }
  0xae   :  { %1377 = vmatpush1.bf16.msra.mxu1 %v2171_v21 }
  0xaf   :  { %1378 = vmatprep.subr.bf16.mxu1 %v2176_v22 }
  0xb0   :  { %996 = vmatpush1.bf16.msra.mxu0 %v2048_v26  ;;  %v2182_v26 = vld [vmem:[#allocation7 + $0x54] ss:$8 sps:$4 sm:$0xff]  }
  0xb1   :  { %997 = vmatprep.subr.bf16.mxu0 %v2053_v27  ;;  %v2180_v27 = vld [vmem:[#allocation7 + $0x50] ss:$8 sps:$4 sm:$0xff]  }
  0xb2   :  { %1379 = vmatpush1.bf16.msra.mxu1 %v2174_v23 }
  0xb3   :  { %1380 = vmatprep.subr.bf16.mxu1 %v2179_v24 }
  0xb4   :  { %998 = vmatpush1.bf16.msra.mxu0 %v2051_v30  ;;  %v2188_v30 = vld [vmem:[#allocation7 + $0x74] ss:$8 sps:$4 sm:$0xff]  }
  0xb5   :  { %999 = vmatprep.subr.bf16.mxu0 %v2056_v31  ;;  %v2186_v31 = vld [vmem:[#allocation7 + $0x70] ss:$8 sps:$4 sm:$0xff]  }
  0xb6   :  { %1381 = vmatpush1.bf16.msra.mxu1 %v2177_v25 }
  0xb7   :  { %1382 = vmatprep.subr.bf16.mxu1 %v2182_v26 }
  0xb8   :  { %1000 = vmatpush1.bf16.msra.mxu0 %v2054_v33 }
  0xb9   :  { %1001 = vmatprep.subr.bf16.mxu0 %v2059_v34 }
  0xba   :  { %1383 = vmatpush1.bf16.msra.mxu1 %v2180_v27 }
  0xbb   :  { %1384 = vmatprep.subr.bf16.mxu1 %v2185_v28 }
  0xbc   :  { %1002 = vmatpush1.bf16.msra.mxu0 %v2057_v35  ;;  %v2189_v35 = vld [vmem:[#allocation7 + $0x80] ss:$8 sps:$4 sm:$0xff]  }
  0xbd   :  { %1003 = vmatprep.subr.bf16.mxu0 %v2062_v36 }
  0xbe   :  { %1385 = vmatpush1.bf16.msra.mxu1 %v2183_v29 }
  0xbf   :  { %1386 = vmatprep.subr.bf16.mxu1 %v2188_v30 }
  0xc0   :  { %1004 = vmatpush1.bf16.msra.mxu0 %v2060_v37  ;;  %v2194_v37 = vld [vmem:[#allocation7 + $0x94] ss:$8 sps:$4 sm:$0xff]  }
  0xc1   :  { %1005 = vmatprep.subr.bf16.mxu0 %v2065_v38 }
  0xc2   :  { %1387 = vmatpush1.bf16.msra.mxu1 %v2186_v31 }
  0xc3   :  { %1388 = vmatprep.subr.bf16.mxu1 %v2191_v32 }
  0xc4   :  { %1006 = vmatpush1.bf16.msra.mxu0 %v2063_v39  ;;  %v2192_v39 = vld [vmem:[#allocation7 + $0x90] ss:$8 sps:$4 sm:$0xff]  }
  0xc5   :  { %1007 = vmatprep.subr.bf16.mxu0 %v2071_v40  ;;  %v2197_v40 = vld [vmem:[#allocation7 + $0xa4] ss:$8 sps:$4 sm:$0xff]  }
  0xc6   :  { %1389 = vmatpush1.bf16.msra.mxu1 %v2189_v35 }
  0xc7   :  { %1390 = vmatprep.subr.bf16.mxu1 %v2194_v37  ;;  %v2365_v37 = vmov 1966171168  }
  0xc8   :  { %1008 = vmatpush1.bf16.msra.mxu0 %v2069_v41  ;;  %v2195_v41 = vld [vmem:[#allocation7 + $0xa0] ss:$8 sps:$4 sm:$0xff]  }
  0xc9   :  { %1018 = vmatprep.subr.bf16.mxu0 %v2077_v43  ;;  %v2198_v43 = vld [vmem:[#allocation7 + $0xb0] ss:$8 sps:$4 sm:$0xff]  }
  0xca   :  { %1391 = vmatpush1.bf16.msra.mxu1 %v2192_v39 }
  0xcb   :  { %1010 = vmatmul.mubr.bf16.vlgmr.msra.gmra.mrb[0].mxu0 %v111_v45  ;;  %1392 = vmatprep.subr.bf16.mxu1 %v2197_v40  ;;  %v2201_v45 = vld [vmem:[#allocation7 + $0xc0] ss:$8 sps:$4 sm:$0xff]  }
  0xcc   :  { %1019 = vmatpush1.bf16.msra.mxu0 %v2075_v46  ;;  %1050 = vmatprep.mubr.bf16.mxu0 %v114_v47  ;;  %v2206_v46 = vld [vmem:[#allocation7 + $0xd4] ss:$8 sps:$4 sm:$0xff]   ;;  %v2204_v47 = vld [vmem:[#allocation7 + $0xd0] ss:$8 sps:$4 sm:$0xff]  }
  0xcd   :  { %1020 = vmatprep.subr.bf16.mxu0 %v2083_v48  ;;  %v2209_v48 = vld [vmem:[#allocation7 + $0xe4] ss:$8 sps:$4 sm:$0xff]  }
  0xce   :  { %1393 = vmatpush1.bf16.msra.mxu1 %v2195_v41 }
  0xcf   :  { %1394 = vmatprep.subr.bf16.mxu1 %v2200_v42 }
  0xd0   :  { %1021 = vmatpush1.bf16.msra.mxu0 %v2081_v49  ;;  %v2207_v49 = vld [vmem:[#allocation7 + $0xe0] ss:$8 sps:$4 sm:$0xff]  }
  0xd1   :  { %1022 = vmatprep.subr.bf16.mxu0 %v2089_v50  ;;  %v2212_v50 = vld [vmem:[#allocation7 + $0xf4] ss:$8 sps:$4 sm:$0xff]  }
  0xd2   :  { %1395 = vmatpush1.bf16.msra.mxu1 %v2198_v43 }
  0xd3   :  { %1396 = vmatprep.subr.bf16.mxu1 %v2203_v44 }
  0xd4   :  { %1023 = vmatpush1.bf16.msra.mxu0 %v2087_v51  ;;  %v2210_v51 = vld [vmem:[#allocation7 + $0xf0] ss:$8 sps:$4 sm:$0xff]  }
  0xd5   :  { %1024 = vmatprep.subr.bf16.mxu0 %v2095_v52  ;;  %v245_v52 = vlaneseq }
  0xd6   :  { %1397 = vmatpush1.bf16.msra.mxu1 %v2201_v45  ;;  %v1092_v45 = vld [vmem:[%s2561_s3] sm:$0x3] }
  0xd7   :  { %1398 = vmatprep.subr.bf16.mxu1 %v2206_v46 }
  0xd8   :  { %1025 = vmatpush1.bf16.msra.mxu0 %v2093_v53  ;;  %v246_v53 = vshrl.u32 %v245_v52, 7 }
  0xd9   :  { %1026 = vmatprep.subr.bf16.mxu0 %v2101_v54 }
  0xda   :  { %1399 = vmatpush1.bf16.msra.mxu1 %v2204_v47  ;;  %v2491_v54 = vsub.s32 0, %v246_v53 }
  0xdb   :  { %1400 = vmatprep.subr.bf16.mxu1 %v2209_v48 }
  0xdc   :  { %1027 = vmatpush1.bf16.msra.mxu0 %v2099_v55  ;;  %v243_v55 = vld [vmem:[%s2560_s2] sm:$0x3] }
  0xdd   :  { %1028 = vmatprep.subr.bf16.mxu0 %v2107_v56  ;;  %v2496_v56 = vsub.s32 1, %v246_v53 }
  0xde   :  { %1401 = vmatpush1.bf16.msra.mxu1 %v2207_v49 }
  0xdf   :  { %1402 = vmatprep.subr.bf16.mxu1 %v2212_v50 }
  0xe0   :  { %1029 = vmatpush1.bf16.msra.mxu0 %v2105_v57  ;;  %v248_v57 = vrot.slane %v243_v55, %v2491_v54 }
  0xe1   :  { %1030 = vmatprep.subr.bf16.mxu0 %v2113_v58  ;;  %v252_v58 = vrot.slane %v243_v55, %v2496_v56 }
  0xe2   :  { %1403 = vmatpush1.bf16.msra.mxu1 %v2210_v51 }
  0xe4   :  { %1031 = vmatpush1.bf16.msra.mxu0 %v2111_v59 }
  0xe5   :  { %1032 = vmatprep.subr.bf16.mxu0 %v2119_v60 }
  0xe8   :  { %1033 = vmatpush1.bf16.msra.mxu0 %v2117_v61 }
  0xe9   :  { %1034 = vmatprep.subr.bf16.mxu0 %v2125_v62 }
  0xec   :  { %1035 = vmatpush1.bf16.msra.mxu0 %v2123_v63 }
  0xed   :  { %1036 = vmatprep.subr.bf16.mxu0 %v2131_v0 }
  0xf0   :  { %1037 = vmatpush1.bf16.msra.mxu0 %v2129_v1 }
  0xf1   :  { %1038 = vmatprep.subr.bf16.mxu0 %v2137_v2 }
  0xf4   :  { %1039 = vmatpush1.bf16.msra.mxu0 %v2135_v3 }
  0xf5   :  { %1040 = vmatprep.subr.bf16.mxu0 %v2143_v4 }
  0xf8   :  { %1041 = vmatpush1.bf16.msra.mxu0 %v2141_v5 }
  0xf9   :  { %1042 = vmatprep.subr.bf16.mxu0 %v2149_v6 }
  0xfc   :  { %1043 = vmatpush1.bf16.msra.mxu0 %v2147_v7 }
  0xfd   :  { %1044 = vmatprep.subr.bf16.mxu0 %v2155_v8 }
 0x100   :  { %1045 = vmatpush1.bf16.msra.mxu0 %v2153_v9 }
 0x101   :  { %1046 = vmatprep.subr.bf16.mxu0 %v2161_v10 }
 0x104   :  { %1047 = vmatpush1.bf16.msra.mxu0 %v2159_v11 }
 0x105   :  { %1048 = vmatprep.subr.bf16.mxu0 %v2164_v12 }
 0x108   :  { %1049 = vmatpush1.bf16.msra.mxu0 %v2162_v13 }
 0x10b   :  { %1051 = vmatmul.mubr.bf16.vlgmr.msra.gmra.mrb[0].mxu0 %v113_v15 }
 0x167   :  { %v929_v33 = vpop.f32.mrb[0].mxu1 }
 0x168   :  { %v931_v34 = vpop.f32.mrb[1].mxu1  ;;  %v930_v59 = vadd.f32 %v929_v33, %v248_v57 }
 0x169   :  { %v933_v36 = vpop.f32.mrb[2].mxu1  ;;  %v932_v60 = vadd.f32 %v931_v34, %v252_v58  ;;  %v1116_v58 = vld [vmem:[%s2562_s4] sm:$0x3] }
 0x16a   :  { %v934_v38 = vpop.f32.mrb[3].mxu1 }
 0x16b   :  { %v1101_v38 = vunpack.c.l.s4 %v2365_v37 }
 0x16d   :  { %v1102_v39 = vunpack.c.0.s8 %v1101_v38 }
 0x16f   :  { %v2500_v41 = vsub.s32 %v1102_v39, %v246_v53 }
 0x1de   :  { %v1052_v61 = vpop.f32.mrb[0].mxu0 }
 0x1df   :  { %v1952_v62 = vadd.f32 %v1052_v61, %v930_v59  ;;  %v1054_v63 = vpop.f32.mrb[1].mxu0 }
 0x1e0   :  { %v1954_v0 = vadd.f32 %v1054_v63, %v932_v60  ;;  %v1056_v1 = vpop.f32.mrb[2].mxu0 }
 0x1e1   :  { %v1059_v2 = vrot.slane %v1952_v62, 4  ;;  %v1057_v3 = vpop.f32.mrb[3].mxu0 }
 0x1e2   :  { %v1065_v4 = vrot.slane %v1954_v0, 4 }
 0x1e3   :  { %v1060_v5 = vadd.f32 %v1952_v62, %v1059_v2 }
 0x1e4   :  { %v1066_v6 = vadd.f32 %v1954_v0, %v1065_v4 }
 0x1e5   :  { %v1061_v7 = vrot.slane %v1060_v5, 2 }
 0x1e6   :  { %v1067_v8 = vrot.slane %v1066_v6, 2 }
 0x1e7   :  { %v1062_v9 = vadd.f32 %v1061_v7, %v1060_v5  ;;  %v2213_v5 = vld [vmem:[#allocation8 + $0x40] sm:$0xff]   ;;  %v2215_v7 = vld [vmem:[#allocation8 + $0x48] sm:$0xff]  }
 0x1e8   :  { %v1068_v10 = vadd.f32 %v1067_v8, %v1066_v6  ;;  %v2214_v6 = vld [vmem:[#allocation8] sm:$0xff]   ;;  %1929 = vmatprep.subr.bf16.mxu1 %v2213_v5  ;;  %v2216_v8 = vld [vmem:[#allocation8 + $0x8] sm:$0xff]  }
 0x1e9   :  { %v1063_v11 = vrot.slane %v1062_v9, 1 }
 0x1ea   :  { %v1069_v12 = vrot.slane %v1068_v10, 1 }
 0x1eb   :  { %v1064_v13 = vadd.f32 %v1063_v11, %v1062_v9  ;;  %v2217_v9 = vld [vmem:[#allocation8 + $0x50] sm:$0xff]   ;;  %v2219_v11 = vld [vmem:[#allocation8 + $0x58] sm:$0xff]  }
 0x1ec   :  { %v1070_v14 = vadd.f32 %v1069_v12, %v1068_v10  ;;  %v2218_v10 = vld [vmem:[#allocation8 + $0x10] sm:$0xff]   ;;  %v2220_v12 = vld [vmem:[#allocation8 + $0x18] sm:$0xff]  }
 0x1ed   :  { %v1072_v15 = vmul.f32 0.125, %v1064_v13  ;;  %v2221_v13 = vld [vmem:[#allocation8 + $0x60] sm:$0xff]  }
 0x1ee   :  { %v1073_v16 = vmul.f32 0.125, %v1070_v14  ;;  %v2222_v14 = vld [vmem:[#allocation8 + $0x20] sm:$0xff]  }
 0x1ef   :  { %v1074_v17 = vsub.f32 %v1952_v62, %v1072_v15 }
 0x1f0   :  { %v1075_v18 = vsub.f32 %v1954_v0, %v1073_v16 }
 0x1f1   :  { %v1076_v19 = vmul.f32 %v1074_v17, %v1074_v17  ;;  %v2225_v17 = vld [vmem:[#allocation8 + $0x70] sm:$0xff]  }
 0x1f2   :  { %v1077_v20 = vmul.f32 %v1075_v18, %v1075_v18  ;;  %v2226_v18 = vld [vmem:[#allocation8 + $0x30] sm:$0xff]  }
 0x1f3   :  { %v1078_v21 = vrot.slane %v1076_v19, 4 }
 0x1f4   :  { %v1084_v22 = vrot.slane %v1077_v20, 4 }
 0x1f5   :  { %v1079_v23 = vadd.f32 %v1078_v21, %v1076_v19  ;;  %v2227_v19 = vld [vmem:[#allocation8 + $0x78] sm:$0xff]   ;;  %v1200_v21 = vld [vmem:[%s2564_s6] sm:$0x3] }
 0x1f6   :  { %v1085_v24 = vadd.f32 %v1084_v22, %v1077_v20  ;;  %v2228_v20 = vld [vmem:[#allocation8 + $0x38] sm:$0xff]   ;;  %v1205_v22 = vrot.slane %v1200_v21, %v2491_v54 }
 0x1f7   :  { %v1080_v25 = vrot.slane %v1079_v23, 2 }
 0x1f8   :  { %v1086_v26 = vrot.slane %v1085_v24, 2 }
 0x1f9   :  { %v1081_v27 = vadd.f32 %v1080_v25, %v1079_v23  ;;  %v1209_v23 = vrot.slane %v1200_v21, %v2496_v56 }
 0x1fa   :  { %v1087_v28 = vadd.f32 %v1086_v26, %v1085_v24 }
 0x1fb   :  { %v1082_v29 = vrot.slane %v1081_v27, 1 }
 0x1fc   :  { %v1088_v30 = vrot.slane %v1087_v28, 1 }
 0x1fd   :  { %v1083_v31 = vadd.f32 %v1082_v29, %v1081_v27 }
 0x1fe   :  { %v1089_v32 = vadd.f32 %v1088_v30, %v1087_v28 }
 0x1ff   :  { %v1090_v33 = vmul.f32 0.125, %v1083_v31 }
 0x200   :  { %v1091_v34 = vmul.f32 0.125, %v1089_v32 }
 0x201   :  { %v1093_v35 = vadd.f32 1e-05, %v1090_v33 }
 0x202   :  { %v1094_v36 = vadd.f32 1e-05, %v1091_v34 }
 0x203   :  { %2229 = vrsqrt.f32 %v1093_v35 }
 0x204   :  { %2231 = vrsqrt.f32 %v1094_v36 }
 0x20d   :  { %v2230_v40 = vpop.eup %2229 }
 0x20e   :  { %v2232_v42 = vpop.eup %2231 }
 0x20f   :  { %v1099_v43 = vcombine.low %v2230_v40, %v2232_v42 }
 0x211   :  { %v1106_v44 = vrot.slane %v1099_v43, %v2500_v41 }
 0x213   :  { %v1113_v46 = vrot.slane %v1106_v44, %v2500_v41 }
 0x215   :  { %v1115_v47 = vmul.f32 %v1113_v46, %v1092_v45 }
 0x217   :  { %v1121_v48 = vrot.slane %v1115_v47, %v2491_v54  ;;  %v1125_v49 = vrot.slane %v1115_v47, %v2496_v56 }
 0x219   :  { %v1128_v50 = vmul.f32 %v1121_v48, %v1072_v15  ;;  %v1129_v51 = vmul.f32 %v1125_v49, %v1073_v16  ;;  %v1150_v52 = vmul.f32 %v1954_v0, %v1125_v49  ;;  %v1149_v53 = vmul.f32 %v1952_v62, %v1121_v48  ;;  %v2223_v15 = vld [vmem:[#allocation8 + $0x68] sm:$0xff]  }
 0x21a   :  { %v2224_v16 = vld [vmem:[#allocation8 + $0x28] sm:$0xff]  }
 0x21b   :  { %v1132_v55 = vcombine.low %v1128_v50, %v1129_v51 }
 0x21d   :  { %v1139_v57 = vrot.slane %v1132_v55, %v2500_v41 }
 0x21f   :  { %v1146_v59 = vrot.slane %v1139_v57, %v2500_v41 }
 0x221   :  { %v1148_v60 = vsub.f32 %v1116_v58, %v1146_v59 }
 0x223   :  { %v1159_v61 = vrot.slane %v1148_v60, %v2496_v56  ;;  %v1155_v63 = vrot.slane %v1148_v60, %v2491_v54 }
 0x225   :  { %v1163_v1 = vadd.f32 %v1159_v61, %v1150_v52  ;;  %v1162_v2 = vadd.f32 %v1155_v63, %v1149_v53 }
 0x227   :  { %v1165_v3 = vmax.f32 %v1163_v1, 0.0  ;;  %v1164_v4 = vmax.f32 %v1162_v2, 0.0 }
 0x229   :  { %v1167_v0 = vpack.c.bf16 %v1165_v3, %v1165_v3  ;;  %v1166_v62 = vpack.c.bf16 %v1164_v4, %v1164_v4 }
 0x22b   :  { %1404 = vmatprep.mubr.bf16.mxu1 %v1167_v0 }
 0x22c   :  { %1405 = vmatmul.mubr.bf16.vlgmr.msra.gmra.mrb[4].mxu1 %v1166_v62 }
 0x22d   :  { %1930 = vmatpush3.bf16.msra.mxu1 %v2214_v6 }
 0x22e   :  { %1931 = vmatprep.subr.bf16.mxu1 %v2215_v7  ;;  %v1445_v7 = vld [vmem:[%s2565_s7] sm:$0x3] }
 0x231   :  { %1932 = vmatpush3.bf16.msra.mxu1 %v2216_v8 }
 0x232   :  { %1933 = vmatprep.subr.bf16.mxu1 %v2217_v9 }
 0x235   :  { %1934 = vmatpush3.bf16.msra.mxu1 %v2218_v10 }
 0x236   :  { %1935 = vmatprep.subr.bf16.mxu1 %v2219_v11 }
 0x239   :  { %1936 = vmatpush3.bf16.msra.mxu1 %v2220_v12 }
 0x23a   :  { %1937 = vmatprep.subr.bf16.mxu1 %v2221_v13 }
 0x23d   :  { %1938 = vmatpush3.bf16.msra.mxu1 %v2222_v14 }
 0x23e   :  { %1939 = vmatprep.subr.bf16.mxu1 %v2223_v15 }
 0x241   :  { %1940 = vmatpush3.bf16.msra.mxu1 %v2224_v16 }
 0x242   :  { %1941 = vmatprep.subr.bf16.mxu1 %v2225_v17 }
 0x245   :  { %1942 = vmatpush3.bf16.msra.mxu1 %v2226_v18  ;;  %v1469_v18 = vld [vmem:[%s2566_s8] sm:$0x3] }
 0x246   :  { %1943 = vmatprep.subr.bf16.mxu1 %v2227_v19 }
 0x249   :  { %1944 = vmatpush3.bf16.msra.mxu1 %v2228_v20 }
 0x2ff   :  { %v1406_v24 = vpop.f32.mrb[4].mxu1 }
 0x300   :  { %v1407_v25 = vadd.f32 %v1406_v24, %v1205_v22  ;;  %v1408_v26 = vpop.f32.mrb[5].mxu1 }
 0x301   :  { %v1409_v27 = vadd.f32 %v1408_v26, %v1209_v23  ;;  %v1410_v28 = vpop.f32.mrb[6].mxu1 }
 0x302   :  { %v1413_v29 = vrot.slane %v1407_v25, 4  ;;  %v1411_v30 = vpop.f32.mrb[7].mxu1 }
 0x303   :  { %v1419_v31 = vrot.slane %v1409_v27, 4  ;;  %v1912_v30 = vld [vmem:[%s2568_s10] ss:$0 sm:$0xff] }
 0x304   :  { %v1414_v32 = vadd.f32 %v1413_v29, %v1407_v25 }
 0x305   :  { %v1420_v33 = vadd.f32 %v1419_v31, %v1409_v27 }
 0x306   :  { %v1415_v34 = vrot.slane %v1414_v32, 2 }
 0x307   :  { %v1421_v35 = vrot.slane %v1420_v33, 2 }
 0x308   :  { %v1416_v36 = vadd.f32 %v1415_v34, %v1414_v32 }
 0x309   :  { %v1422_v37 = vadd.f32 %v1421_v35, %v1420_v33 }
 0x30a   :  { %v1417_v38 = vrot.slane %v1416_v36, 1 }
 0x30b   :  { %v1423_v39 = vrot.slane %v1422_v37, 1 }
 0x30c   :  { %v1418_v40 = vadd.f32 %v1417_v38, %v1416_v36 }
 0x30d   :  { %v1424_v42 = vadd.f32 %v1423_v39, %v1422_v37 }
 0x30e   :  { %v1425_v43 = vmul.f32 0.125, %v1418_v40 }
 0x30f   :  { %v1426_v44 = vmul.f32 0.125, %v1424_v42 }
 0x310   :  { %v1427_v45 = vsub.f32 %v1407_v25, %v1425_v43 }
 0x311   :  { %v1428_v46 = vsub.f32 %v1409_v27, %v1426_v44 }
 0x312   :  { %v1429_v47 = vmul.f32 %v1427_v45, %v1427_v45 }
 0x313   :  { %v1430_v48 = vmul.f32 %v1428_v46, %v1428_v46 }
 0x314   :  { %v1431_v49 = vrot.slane %v1429_v47, 4 }
 0x315   :  { %v1437_v50 = vrot.slane %v1430_v48, 4 }
 0x316   :  { %v1432_v51 = vadd.f32 %v1431_v49, %v1429_v47 }
 0x317   :  { %v1438_v52 = vadd.f32 %v1437_v50, %v1430_v48 }
 0x318   :  { %v1433_v53 = vrot.slane %v1432_v51, 2 }
 0x319   :  { %v1439_v55 = vrot.slane %v1438_v52, 2 }
 0x31a   :  { %v1434_v57 = vadd.f32 %v1433_v53, %v1432_v51 }
 0x31b   :  { %v1440_v58 = vadd.f32 %v1439_v55, %v1438_v52  ;;  %v1712_v52 = vld [vmem:[%s2569_s11] sm:$0x1]  ;;  %s2327_s11 = scalar_lea.vmem %s1742_s17, 128 }
 0x31c   :  { %v1435_v59 = vrot.slane %v1434_v57, 1  ;;  %p2328_p4 = scmp.ne.s32.totalorder %s1742_s17, %s2327_s11  ;;  %p2333_p6 = scmp.lt.s32.totalorder %s2327_s11, %s2327_s11 }
 0x31d   :  { %v1441_v60 = vrot.slane %v1440_v58, 1 }
 0x31e   :  { %v1436_v61 = vadd.f32 %v1435_v59, %v1434_v57  ;;  %v1716_v57 = vld [vmem:[%s2570_s12] sm:$0x1]  ;;  %p2334_p7 = por %p2333_p6, %p2332_p5 }
 0x31f   :  { %v1442_v63 = vadd.f32 %v1441_v60, %v1440_v58 }
 0x320   :  { %v1443_v1 = vmul.f32 0.125, %v1436_v61  ;;  %p2335_p8 = pnand %p2334_p7, %p2328_p4 }
 0x321   :  { %v1444_v2 = vmul.f32 0.125, %v1442_v63 }
 0x322   :  { %v1446_v3 = vadd.f32 1e-05, %v1443_v1 }
 0x323   :  { %v1447_v4 = vadd.f32 1e-05, %v1444_v2 }
 0x324   :  { %2233 = vrsqrt.f32 %v1446_v3 }
 0x325   :  { %2235 = vrsqrt.f32 %v1447_v4 }
 0x32e   :  { %v2234_v0 = vpop.eup %2233 }
 0x32f   :  { %v2236_v62 = vpop.eup %2235 }
 0x330   :  { %v1452_v5 = vcombine.low %v2234_v0, %v2236_v62 }
 0x332   :  { %v1459_v6 = vrot.slane %v1452_v5, %v2500_v41 }
 0x334   :  { %v1466_v8 = vrot.slane %v1459_v6, %v2500_v41 }
 0x336   :  { %v1468_v9 = vmul.f32 %v1466_v8, %v1445_v7 }
 0x338   :  { %v1474_v10 = vrot.slane %v1468_v9, %v2491_v54  ;;  %v1478_v11 = vrot.slane %v1468_v9, %v2496_v56 }
 0x33a   :  { %v1481_v12 = vmul.f32 %v1474_v10, %v1425_v43  ;;  %v1482_v13 = vmul.f32 %v1478_v11, %v1426_v44  ;;  %v1503_v14 = vmul.f32 %v1478_v11, %v1409_v27  ;;  %v1502_v15 = vmul.f32 %v1474_v10, %v1407_v25 }
 0x33c   :  { %v1485_v16 = vcombine.low %v1481_v12, %v1482_v13 }
 0x33e   :  { %v1492_v17 = vrot.slane %v1485_v16, %v2500_v41 }
 0x340   :  { %v1499_v19 = vrot.slane %v1492_v17, %v2500_v41 }
 0x342   :  { %v1501_v20 = vsub.f32 %v1469_v18, %v1499_v19 }
 0x344   :  { %v1512_v21 = vrot.slane %v1501_v20, %v2496_v56  ;;  %v1508_v22 = vrot.slane %v1501_v20, %v2491_v54 }
 0x346   :  { %v1516_v23 = vadd.f32 %v1512_v21, %v1503_v14  ;;  %v1515_v24 = vadd.f32 %v1508_v22, %v1502_v15 }
 0x348   :  { %v1518_v26 = vmax.f32 %v1516_v23, 0.0  ;;  %v1517_v28 = vmax.f32 %v1515_v24, 0.0 }
 0x34a   :  { %v1520_v27 = vpack.c.bf16 %v1518_v26, %v1518_v26  ;;  %v1519_v25 = vpack.c.bf16 %v1517_v28, %v1517_v28 }
 0x34c   :  { %1688 = vmatprep.mubr.bf16.mxu1 %v1520_v27 }
 0x34d   :  { %1689 = vmatmul.mubr.bf16.vlgmr.msra.gmra.mrb[8].mxu1 %v1519_v25 }
 0x420   :  { %v1945_v29 = vpop.f32.mrb[8].mxu1 }
 0x421   :  { %v1946_v31 = vpop.f32.mrb[9].mxu1 }
 0x422   :  { %v1947_v41 = vadd.f32 %v1946_v31, %v1945_v29  ;;  %v1948_v32 = vpop.f32.mrb[10].mxu1 }
 0x423   :  { %v1949_v33 = vpop.f32.mrb[11].mxu1 }
 0x424   :  { %v1691_v56 = vadd.f32 %v1947_v41, %v1912_v30 }
 0x426   :  { %v1696_v34 = vrot.slane %v1691_v56, 4 }
 0x428   :  { %v1697_v35 = vadd.f32 %v1696_v34, %v1691_v56 }
 0x42a   :  { %v1698_v36 = vrot.slane %v1697_v35, 2 }
 0x42c   :  { %v1699_v37 = vadd.f32 %v1698_v36, %v1697_v35 }
 0x42e   :  { %v1700_v38 = vrot.slane %v1699_v37, 1 }
 0x430   :  { %v1701_v39 = vadd.f32 %v1700_v38, %v1699_v37 }
 0x432   :  { %v1702_v40 = vmul.f32 0.125, %v1701_v39 }
 0x434   :  { %v1703_v42 = vsub.f32 %v1691_v56, %v1702_v40 }
 0x436   :  { %v1704_v43 = vmul.f32 %v1703_v42, %v1703_v42 }
 0x438   :  { %v1705_v44 = vrot.slane %v1704_v43, 4 }
 0x43a   :  { %v1706_v45 = vadd.f32 %v1705_v44, %v1704_v43 }
 0x43c   :  { %v1707_v46 = vrot.slane %v1706_v45, 2 }
 0x43e   :  { %v1708_v47 = vadd.f32 %v1707_v46, %v1706_v45 }
 0x440   :  { %v1709_v48 = vrot.slane %v1708_v47, 1 }
 0x442   :  { %v1710_v49 = vadd.f32 %v1709_v48, %v1708_v47 }
 0x444   :  { %v1711_v50 = vmul.f32 0.125, %v1710_v49 }
 0x446   :  { %v1713_v51 = vadd.f32 1e-05, %v1711_v50 }
 0x448   :  { %2237 = vrsqrt.f32 %v1713_v51 }
 0x452   :  { %v2238_v53 = vpop.eup %2237 }
 0x453   :  { %v1715_v55 = vmul.f32 %v2238_v53, %v1712_v52 }
 0x455   :  { %v1717_v58 = vmul.f32 %v1715_v55, %v1702_v40  ;;  %v1723_v59 = vrot.slane %v1715_v55, %v2491_v54 }
 0x457   :  { %v1718_v60 = vsub.f32 %v1716_v57, %v1717_v58  ;;  %v1725_v61 = vmul.f32 %v1723_v59, %v1691_v56 }
 0x459   :  { %v1730_v63 = vrot.slane %v1718_v60, %v2491_v54 }
 0x45b   :  { %v1732_v1 = vadd.f32 %v1730_v63, %v1725_v61 }
 0x45d   :  { %v1733_v2 = vmax.f32 %v1732_v1, 0.0 }
 0x45f   :  { %1734 = vst [vmem:[#allocation10] sm:$0xff] %v1733_v2 }
 0x460   :  { %2338 = shalt.err (!%p2335_p8)
}
 0x461   :  { %s2339_s21 = scalar_lea.hbm %s2571_s13, 128 }
 0x462   :  { %p2340_p9 = scmp.ne.s32.totalorder %s2571_s13, %s2339_s21  ;;  %p2343_p10 = scmp.lt.u32.totalorder %s2339_s21, %s2571_s13 }
 0x464   :  { %p2345_p11 = pnand %p2343_p10, %p2340_p9 }
 0x466   :  { %2348 = shalt.err (!%p2345_p11)
}
 0x467   :  { %1744 = dma.vmem_to_hbm [thread:$0]  %s1742_s17, 128, %s2571_s13, [#allocation4]  }
 0x468   :  { %2355 = dma.done.wait [#allocation4], 128  }
 0x469   :  { %2356 = vsyncadd [#allocation4], 4294967168 }
 0x46a   :  { %1748 = vsyncpa [#allocation3], 1 }
 0x46b   :  { %1749 = vsyncpa [#allocation6], 1 }
 0x46c   :  { %1750 = vsyncpa [#allocation9], 1 }
 0x46d   :  { %1751 = vsyncpa [#allocation4], 1 }

</bundles_post_ra>
